<compile_context>
chip_gen: v6e
topology: v6e:2x2x1
jax: 0.10.0
libtpu: 0.0.40
codegen_flags: <defaults>
</compile_context>

<pallas_src>
from collections import namedtuple

import jax
import jax.numpy as jnp
from jax import lax
from jax.experimental import pallas as pl
from jax.experimental.pallas import tpu as pltpu

SRLResult = namedtuple("SRLResult",
                       ["loss", "rel_logits", "decoded", "labels", "transitions"])


# ------------------------------------------------------------------ helpers
def _round_up(x, m):
    return (x + m - 1) // m * m


def _pick_row_tile(n_rows, bytes_per_row, max_tile=128, budget=4 * 1024 * 1024):
    """Row tile keeping one block well under the scoped-VMEM budget (v7x-safe:
    ~4 MiB per block leaves headroom for double buffering on 64 MiB parts)."""
    tile = max(8, min(max_tile, (budget // max(bytes_per_row, 1)) // 8 * 8))
    if n_rows < tile:
        tile = _round_up(max(n_rows, 1), 8)
    return tile


# ------------------------------------------------------------------ fused MLP
def _mlp_kernel(x_ref, w_ref, b_ref, h_ref, d_ref):
    # One (TM, D) @ (D, 2H) matmul for both rel_h and rel_d, split + ReLU.
    y = jnp.dot(x_ref[...], w_ref[...], preferred_element_type=jnp.float32)
    y = jnp.maximum(y + b_ref[...], 0.0)          # dropout == identity in eval
    hsz = h_ref.shape[1]
    h_ref[...] = y[:, :hsz]
    d_ref[...] = y[:, hsz:]


def mlp_pair(x2d, w_hd, b_hd):
    R, D = x2d.shape
    H2 = w_hd.shape[1]
    H = H2 // 2
    TM = _pick_row_tile(R, (D + H2) * 4, max_tile=256)
    Rpad = _round_up(R, TM)
    x_p = jnp.zeros((Rpad, D), jnp.float32).at[:R].set(x2d.astype(jnp.float32))
    h, d = pl.pallas_call(
        _mlp_kernel,
        out_shape=(jax.ShapeDtypeStruct((Rpad, H), jnp.float32),
                   jax.ShapeDtypeStruct((Rpad, H), jnp.float32)),
        grid=(Rpad // TM,),
        in_specs=[pl.BlockSpec((TM, D), lambda i: (i, 0)),
                  pl.BlockSpec((D, H2), lambda i: (0, 0)),
                  pl.BlockSpec((1, H2), lambda i: (0, 0))],
        out_specs=(pl.BlockSpec((TM, H), lambda i: (i, 0)),
                   pl.BlockSpec((TM, H), lambda i: (i, 0))),
        compiler_params=pltpu.CompilerParams(
            dimension_semantics=("parallel",)),
    )(x_p, w_hd.astype(jnp.float32), b_hd.reshape(1, -1).astype(jnp.float32))
    return h[:R], d[:R]


# ---------------------------------------------------------------- Biaffine
def _biaffine_kernel(d_ref, h_ref, wall_ref, call_ref, bmat_ref, erow_ref, o_ref):
    # s[i, l, j] = (d_i @ A_l + c_l) . h_j + (d_i . b_l + e_l)
    # where W_l = [[A_l, b_l], [c_l^T, e_l]]  (bias_x = bias_y = True, no H+1 K).
    TSI, H = d_ref.shape[1], d_ref.shape[2]
    L = erow_ref.shape[1]
    d = d_ref[0]                                              # (TSI, H)
    h = h_ref[0]                                              # (S, H)
    tmp = jnp.dot(d, wall_ref[...],
                  preferred_element_type=jnp.float32) + call_ref[...]   # (TSI, L*H)
    bias = jnp.dot(d, bmat_ref[...],
                   preferred_element_type=jnp.float32) + erow_ref[...]  # (TSI, L)
    for l in range(L):        # L dense (TSI, S) matmuls + dense stores, no relayout
        core = lax.dot_general(tmp[:, l * H:(l + 1) * H], h,
                               (((1,), (1,)), ((), ())),
                               preferred_element_type=jnp.float32)      # (TSI, S)
        o_ref[0, l] = core + bias[:, l:l + 1]


def biaffine(rel_d, rel_h, w_all, c_all, b_mat, e_row):
    B, S, H = rel_d.shape
    L = e_row.shape[1]
    TSI = S if S <= 128 else 128
    assert S % TSI == 0, "seq length must be a multiple of the row tile"
    return pl.pallas_call(
        _biaffine_kernel,
        out_shape=jax.ShapeDtypeStruct((B, L, S, S), jnp.float32),
        grid=(B, S // TSI),
        in_specs=[pl.BlockSpec((1, TSI, H), lambda b, i: (b, i, 0)),
                  pl.BlockSpec((1, S, H), lambda b, i: (b, 0, 0)),
                  pl.BlockSpec((H, L * H), lambda b, i: (0, 0)),
                  pl.BlockSpec((1, L * H), lambda b, i: (0, 0)),
                  pl.BlockSpec((H, L), lambda b, i: (0, 0)),
                  pl.BlockSpec((1, L), lambda b, i: (0, 0))],
        out_specs=pl.BlockSpec((1, L, TSI, S), lambda b, i: (b, 0, i, 0)),
        compiler_params=pltpu.CompilerParams(
            dimension_semantics=("parallel", "parallel")),
    )(rel_d, rel_h, w_all, c_all, b_mat, e_row)


# --------------------------------------------------- CRF log-likelihood (loss)
def _crf_llh_kernel(s_ref, tags_ref, mask_ref, start_ref, trans_ref, end_ref,
                    llh_ref):
    TN, T, L = s_ref.shape
    tags = tags_ref[...]                      # (TN, T) int32
    mask = mask_ref[...]                      # (TN, T) f32 {0,1}
    start = start_ref[...]                    # (1, L)
    trans = trans_ref[...]                    # (L, L)
    end = end_ref[...]                        # (1, L)
    lab = lax.broadcasted_iota(jnp.int32, (TN, L), 1)
    t_iota = lax.broadcasted_iota(jnp.int32, (TN, T), 1)

    def emis(t):                              # per-step log-softmax emissions
        s_t = s_ref[:, pl.ds(t, 1), :][:, 0, :]                     # (TN, L)
        mx = jnp.max(s_t, axis=-1, keepdims=True)
        z = s_t - mx
        return z - jnp.log(jnp.sum(jnp.exp(z), axis=-1, keepdims=True))

    def col_f(a, t):                          # column t of (TN, T) floats -> (TN, 1)
        return jnp.sum(a * (t_iota == t).astype(jnp.float32),
                       axis=1, keepdims=True)

    def col_tag(t):                           # column t of tags -> (TN, 1) int32
        return jnp.sum(tags * (t_iota == t).astype(jnp.int32),
                       axis=1, keepdims=True)

    e0 = emis(0)
    oh0 = (tags[:, 0:1] == lab).astype(jnp.float32)                 # (TN, L)
    score0 = jnp.sum(oh0 * (start + e0), axis=-1, keepdims=True)    # (TN, 1)
    alpha0 = start + e0                                             # (TN, L)

    def body(t, carry):
        score, alpha, oh_last = carry
        e_t = emis(t)
        m_t = col_f(mask, t)                                        # (TN, 1)
        oh_t = (col_tag(t) == lab).astype(jnp.float32)              # (TN, L)
        oh_p = (col_tag(t - 1) == lab).astype(jnp.float32)          # (TN, L)
        # gold-path transition/emission (gather via tiny one-hot matvec, no NxTxL)
        tr = jnp.sum(jnp.dot(oh_p, trans, preferred_element_type=jnp.float32)
                     * oh_t, axis=-1, keepdims=True)
        em = jnp.sum(e_t * oh_t, axis=-1, keepdims=True)
        score = score + (tr + em) * m_t
        oh_last = jnp.where(m_t > 0.5, oh_t, oh_last)
        # forward algorithm (logsumexp over previous label)
        x = alpha[:, :, None] + trans[None, :, :] + e_t[:, None, :]  # (TN, L, L)
        xm = jnp.max(x, axis=1)
        nxt = xm + jnp.log(jnp.sum(jnp.exp(x - xm[:, None, :]), axis=1))
        alpha = jnp.where(m_t > 0.5, nxt, alpha)
        return score, alpha, oh_last

    score, alpha, oh_last = lax.fori_loop(1, T, body, (score0, alpha0, oh0),
                                          unroll=2)
    score = score + jnp.sum(oh_last * end, axis=-1, keepdims=True)
    alpha = alpha + end
    am = jnp.max(alpha, axis=-1, keepdims=True)
    denom = am + jnp.log(jnp.sum(jnp.exp(alpha - am), axis=-1, keepdims=True))
    llh_ref[...] = score - denom


def crf_log_likelihood(s_sel, tags_sel, mask_sel, start, trans, end):
    N, T, L = s_sel.shape
    TN = _pick_row_tile(N, T * L * 4)
    Npad = _round_up(N, TN)
    s_p = jnp.zeros((Npad, T, L), jnp.float32).at[:N].set(s_sel.astype(jnp.float32))
    tg_p = jnp.zeros((Npad, T), jnp.int32).at[:N].set(tags_sel.astype(jnp.int32))
    mk_p = jnp.zeros((Npad, T), jnp.float32).at[:N].set(mask_sel.astype(jnp.float32))
    llh = pl.pallas_call(
        _crf_llh_kernel,
        out_shape=jax.ShapeDtypeStruct((Npad, 1), jnp.float32),
        grid=(Npad // TN,),
        in_specs=[pl.BlockSpec((TN, T, L), lambda n: (n, 0, 0)),
                  pl.BlockSpec((TN, T), lambda n: (n, 0)),
                  pl.BlockSpec((TN, T), lambda n: (n, 0)),
                  pl.BlockSpec((1, L), lambda n: (0, 0)),
                  pl.BlockSpec((L, L), lambda n: (0, 0)),
                  pl.BlockSpec((1, L), lambda n: (0, 0))],
        out_specs=pl.BlockSpec((TN, 1), lambda n: (n, 0)),
        compiler_params=pltpu.CompilerParams(
            dimension_semantics=("parallel",)),
    )(s_p, tg_p, mk_p,
      start.reshape(1, -1).astype(jnp.float32),
      trans.astype(jnp.float32),
      end.reshape(1, -1).astype(jnp.float32))
    return llh[:N, 0]


# --------------------------------------------------------- Viterbi decoding
def _viterbi_fwd_kernel(s_ref, mask_ref, start_ref, trans_ref, end_ref,
                        score_ref, hist_ref):
    TN, T, L = s_ref.shape
    mask = mask_ref[...]
    start = start_ref[...]
    trans = trans_ref[...]
    end = end_ref[...]
    t_iota = lax.broadcasted_iota(jnp.int32, (TN, T), 1)
    prev_iota = lax.broadcasted_iota(jnp.int32, (TN, L, L), 1)

    def emis(t):
        # Raw scores: log_softmax is a per-(row, step) constant shift, so it
        # does not change the decoded path and is skipped here.
        return s_ref[:, pl.ds(t, 1), :][:, 0, :]                    # (TN, L)

    hist_ref[0] = jnp.zeros((TN, L), jnp.int32)

    def body(t, score):
        e_t = emis(t)
        nxt = score[:, :, None] + trans[None, :, :] + e_t[:, None, :]  # (TN, L, L)
        best = jnp.max(nxt, axis=1)                                    # (TN, L)
        first_max = jnp.min(jnp.where(nxt == best[:, None, :], prev_iota, L),
                            axis=1)                                    # argmax (first)
        hist_ref[t] = first_max.astype(jnp.int32)
        m_t = jnp.sum(mask * (t_iota == t).astype(jnp.float32),
                      axis=1, keepdims=True)
        return jnp.where(m_t > 0.5, best, score)

    score = lax.fori_loop(1, T, body, start + emis(0), unroll=2)
    score_ref[...] = score + end


def viterbi_decode(s_sel, mask_sel, start, trans, end):
    N, T, L = s_sel.shape
    TN = _pick_row_tile(N, T * L * 8)      # f32 emissions + int32 history per row
    Npad = _round_up(N, TN)
    s_p = jnp.zeros((Npad, T, L), jnp.float32).at[:N].set(s_sel.astype(jnp.float32))
    mk_p = jnp.zeros((Npad, T), jnp.float32).at[:N].set(mask_sel.astype(jnp.float32))
    score, hist = pl.pallas_call(
        _viterbi_fwd_kernel,
        out_shape=(jax.ShapeDtypeStruct((Npad, L), jnp.float32),
                   jax.ShapeDtypeStruct((T, Npad, L), jnp.int32)),
        grid=(Npad // TN,),
        in_specs=[pl.BlockSpec((TN, T, L), lambda n: (n, 0, 0)),
                  pl.BlockSpec((TN, T), lambda n: (n, 0)),
                  pl.BlockSpec((1, L), lambda n: (0, 0)),
                  pl.BlockSpec((L, L), lambda n: (0, 0)),
                  pl.BlockSpec((1, L), lambda n: (0, 0))],
        out_specs=(pl.BlockSpec((TN, L), lambda n: (n, 0)),
                   pl.BlockSpec((T, TN, L), lambda n: (0, n, 0))),
        compiler_params=pltpu.CompilerParams(
            dimension_semantics=("parallel",)),
    )(s_p, mk_p,
      start.reshape(1, -1).astype(jnp.float32),
      trans.astype(jnp.float32),
      end.reshape(1, -1).astype(jnp.float32))
    score = score[:N]                      # (N, L)
    hist = hist[:, :N, :]                  # (T, N, L)
    mask_b = mask_sel.astype(bool)

    # Backtrack: O(N*T) integer gathers -> plain-JAX lax.scan (padded output,
    # -1 at masked positions stands in for torchcrf's variable-length lists).
    cur = jnp.argmax(score, axis=-1).astype(jnp.int32)               # (N,)

    def step(c, xs):
        hist_t, m_t = xs
        prev = jnp.take_along_axis(hist_t, c[:, None], axis=1)[:, 0]
        c = jnp.where(m_t, prev.astype(jnp.int32), c)
        return c, c

    hist_rev = hist[1:][::-1]                                        # t = T-1 .. 1
    mask_rev = jnp.transpose(mask_b, (1, 0))[1:][::-1]
    _, tags_rev = lax.scan(step, cur, (hist_rev, mask_rev))
    tags = jnp.concatenate([tags_rev[::-1], cur[None, :]], axis=0)   # (T, N)
    tags = jnp.transpose(tags, (1, 0))                               # (N, T)
    return jnp.where(mask_b, tags, -1)


# ------------------------------------------------------------------ forward
def biaffine_crf_forward(params, x, logits_mask=None, word_index=None,
                         word_attention_mask=None, labels=None, training=False):
    if word_index is not None:
        idx = jnp.broadcast_to(word_index[:, :, None],
                               word_index.shape + (x.shape[-1],))
        x = jnp.take_along_axis(x, idx, axis=1)
    B, S, D = x.shape
    H = params["wh"].shape[1]
    L = params["w_att"].shape[0]

    # ---- MLP_h / MLP_d fused into one Linear(D -> 2H) + ReLU ----
    w_hd = jnp.concatenate([params["wh"], params["wd"]], axis=1)     # (D, 2H)
    b_hd = jnp.concatenate([params["bh"], params["bd"]], axis=0)     # (2H,)
    rel_h, rel_d = mlp_pair(x.reshape(B * S, D), w_hd, b_hd)
    rel_h = rel_h.reshape(B, S, H)
    rel_d = rel_d.reshape(B, S, H)

    # ---- Biaffine: bias columns folded out of the contraction, L collapsed ----
    W = params["w_att"].astype(jnp.float32)                          # (L, H+1, H+1)
    w_all = jnp.transpose(W[:, :H, :H], (1, 0, 2)).reshape(H, L * H)  # A_l packed
    c_all = W[:, H, :H].reshape(1, L * H)                             # c_l packed
    b_mat = jnp.transpose(W[:, :H, H], (1, 0))                        # (H, L)
    e_row = W[:, H, H].reshape(1, L)                                  # (1, L)
    s_blxy = biaffine(rel_d, rel_h, w_all, c_all, b_mat, e_row)       # (B, L, S, S)
    # TODO(synk): this permute is one extra HBM pass; fusing the L->lane relayout
    # into the biaffine kernel needs a lane/sublane transpose of the MXU tiles and
    # was left to XLA for lowering robustness.
    s_rel = jnp.transpose(s_blxy, (0, 2, 3, 1))                       # (B, S, S, L)

    if logits_mask is None:
        logits_mask = word_attention_mask
    mask2 = logits_mask[:, :, None] & logits_mask[:, None, :]         # (B, S, S)
    mask_flat = mask2.reshape(B * S, S)
    index = mask_flat[:, 0]
    # TODO(synk): data-dependent boolean row selection matches the reference but is
    # eager-only (variable N); a fixed-shape masked CRF would be needed under jit.
    mask_sel = mask_flat[index]                                       # (N, S) bool
    s_sel = s_rel.reshape(B * S, S, L)[index]                         # (N, S, L)
    labels_sel = labels.reshape(B * S, S)[index] if labels is not None else None

    loss = None
    if labels_sel is not None:
        llh = crf_log_likelihood(s_sel, labels_sel, mask_sel,
                                 params["crf_start"], params["crf_trans"],
                                 params["crf_end"])
        loss = -jnp.sum(llh)                                          # reduction='sum'

    decoded = None
    if not training:
        decoded = viterbi_decode(s_sel, mask_sel,
                                 params["crf_start"], params["crf_trans"],
                                 params["crf_end"])

    return SRLResult(loss=loss, rel_logits=s_sel, decoded=decoded,
                     labels=labels_sel,
                     transitions=(params["crf_start"], params["crf_trans"],
                                  params["crf_end"]))


# --------------------------------------------------------------------- main
if __name__ == "__main__":
    key = jax.random.PRNGKey(0)
    B, S_tok, S, D, H, L = 2, 12, 8, 32, 32, 8
    ks = jax.random.split(key, 12)

    x = jax.random.normal(ks[0], (B, S_tok, D), jnp.float32)
    word_index = jnp.sort(jax.random.randint(ks[1], (B, S), 0, S_tok), axis=1)
    lengths = jnp.array([8, 5])
    word_attention_mask = jnp.arange(S)[None, :] < lengths[:, None]
    labels = jax.random.randint(ks[2], (B, S, S), 0, L)

    params = {
        "wh": 0.1 * jax.random.normal(ks[3], (D, H), jnp.float32),
        "bh": 0.1 * jax.random.normal(ks[4], (H,), jnp.float32),
        "wd": 0.1 * jax.random.normal(ks[5], (D, H), jnp.float32),
        "bd": 0.1 * jax.random.normal(ks[6], (H,), jnp.float32),
        # Bilinear weight: (label_num, hidden+1, hidden+1)  (bias_x=bias_y=True)
        "w_att": 0.1 * jax.random.normal(ks[7], (L, H + 1, H + 1), jnp.float32),
        # CRF params (torchcrf inits uniform(-0.1, 0.1))
        "crf_start": 0.1 * jax.random.uniform(ks[8], (L,), jnp.float32, -1.0, 1.0),
        "crf_trans": 0.1 * jax.random.uniform(ks[9], (L, L), jnp.float32, -1.0, 1.0),
        "crf_end": 0.1 * jax.random.uniform(ks[10], (L,), jnp.float32, -1.0, 1.0),
    }

    out = biaffine_crf_forward(params, x,
                               word_index=word_index,
                               word_attention_mask=word_attention_mask,
                               labels=labels, training=False)
    jax.block_until_ready(out.loss)
    jax.block_until_ready(out.rel_logits)
    jax.block_until_ready(out.decoded)
    assert bool(jnp.isfinite(out.loss))
    assert out.decoded.shape == out.labels.shape
    print("KERNEL_OK")
</pallas_src>

<mosaic_0001>
module attributes {stable_mosaic.version = 11 : i64} {
  func.func @_mlp_kernel(%arg0: i32, %arg1: memref<16x32xf32, #tpu.memory_space<vmem>>, %arg2: memref<32x64xf32, #tpu.memory_space<vmem>>, %arg3: memref<1x64xf32, #tpu.memory_space<vmem>>, %arg4: memref<16x32xf32, #tpu.memory_space<vmem>>, %arg5: memref<16x32xf32, #tpu.memory_space<vmem>>) attributes {dimension_semantics = [#tpu.dimension_semantics<parallel>], iteration_bounds = array<i64: 1>, scalar_prefetch = 0 : i64, scratch_operands = 0 : i64, tpu.core_type = #tpu.core_type<tc>, window_params = [{transform_indices = @transform_0, window_bounds = array<i64: 16, 32>}, {pipeline_mode = #tpu.pipeline_mode<synchronous>, transform_indices = @transform_1, window_bounds = array<i64: 32, 64>}, {pipeline_mode = #tpu.pipeline_mode<synchronous>, transform_indices = @transform_2, window_bounds = array<i64: 1, 64>}, {transform_indices = @transform_3, window_bounds = array<i64: 16, 32>}, {transform_indices = @transform_4, window_bounds = array<i64: 16, 32>}]} {
    %c0 = arith.constant 0 : index
    %c0_0 = arith.constant 0 : index
    %0 = vector.load %arg1[%c0, %c0_0] : memref<16x32xf32, #tpu.memory_space<vmem>>, vector<16x32xf32>
    %c0_1 = arith.constant 0 : index
    %c0_2 = arith.constant 0 : index
    %1 = vector.load %arg2[%c0_1, %c0_2] : memref<32x64xf32, #tpu.memory_space<vmem>>, vector<32x64xf32>
    %cst = arith.constant dense<0.000000e+00> : vector<16x64xf32>
    %2 = tpu.matmul %0, %1, %cst {dimension_numbers = #tpu.dot_dimension_numbers<[1], [0], [0], [1], [0, 0, 1, 1], [], []>} : vector<16x32xf32>, vector<32x64xf32>, vector<16x64xf32> -> vector<16x64xf32>
    %c0_3 = arith.constant 0 : index
    %c0_4 = arith.constant 0 : index
    %3 = vector.load %arg3[%c0_3, %c0_4] : memref<1x64xf32, #tpu.memory_space<vmem>>, vector<1x64xf32>
    %4 = vector.broadcast %3 : vector<1x64xf32> to vector<16x64xf32>
    %5 = arith.addf %2, %4 : vector<16x64xf32>
    %cst_5 = arith.constant 0.000000e+00 : f32
    %6 = vector.broadcast %cst_5 : f32 to vector<16x64xf32>
    %7 = arith.maximumf %5, %6 : vector<16x64xf32>
    %8 = vector.extract_strided_slice %7 {offsets = [0, 0], sizes = [16, 32], strides = [1, 1]} : vector<16x64xf32> to vector<16x32xf32>
    %c0_6 = arith.constant 0 : index
    %c0_7 = arith.constant 0 : index
    %9 = vector.load %arg4[%c0_6, %c0_7] : memref<16x32xf32, #tpu.memory_space<vmem>>, vector<16x32xf32>
    tpu.vector_store %arg4[%c0_6, %c0_7], %8 {strides = array<i32>} : memref<16x32xf32, #tpu.memory_space<vmem>>, vector<16x32xf32>,
    %10 = vector.extract_strided_slice %7 {offsets = [0, 32], sizes = [16, 32], strides = [1, 1]} : vector<16x64xf32> to vector<16x32xf32>
    %c0_8 = arith.constant 0 : index
    %c0_9 = arith.constant 0 : index
    %11 = vector.load %arg5[%c0_8, %c0_9] : memref<16x32xf32, #tpu.memory_space<vmem>>, vector<16x32xf32>
    tpu.vector_store %arg5[%c0_8, %c0_9], %10 {strides = array<i32>} : memref<16x32xf32, #tpu.memory_space<vmem>>, vector<16x32xf32>,
    return
  }
  func.func @transform_0(%arg0: i32) -> (i32, i32) {
    %c0_i32 = arith.constant 0 : i32
    %c0_i32_0 = arith.constant 0 : i32
    return %arg0, %c0_i32 : i32, i32
  }
  func.func @transform_1(%arg0: i32) -> (i32, i32) {
    %c0_i32 = arith.constant 0 : i32
    %c0_i32_0 = arith.constant 0 : i32
    %c0_i32_1 = arith.constant 0 : i32
    return %c0_i32, %c0_i32_0 : i32, i32
  }
  func.func @transform_2(%arg0: i32) -> (i32, i32) {
    %c0_i32 = arith.constant 0 : i32
    %c0_i32_0 = arith.constant 0 : i32
    %c0_i32_1 = arith.constant 0 : i32
    return %c0_i32, %c0_i32_0 : i32, i32
  }
  func.func @transform_3(%arg0: i32) -> (i32, i32) {
    %c0_i32 = arith.constant 0 : i32
    %c0_i32_0 = arith.constant 0 : i32
    return %arg0, %c0_i32 : i32, i32
  }
  func.func @transform_4(%arg0: i32) -> (i32, i32) {
    %c0_i32 = arith.constant 0 : i32
    %c0_i32_0 = arith.constant 0 : i32
    return %arg0, %c0_i32 : i32, i32
  }
}

</mosaic_0001>

<bundles_post_ra>
// kernel: tpu_custom_call.1
= control target key start
LH: loop header
LB: loop body
LE: loop exit
PB: predicated region body
PF: predicated region fallthrough
CT: control target
= control target key end

     0   :  { %10 = vsyncpa [#allocation3], 0  ;;  %s369_s0 = inlined_call_operand.hbm [shape: f32[16,32], index: 0, kind: input, shape index: {}]   ;;  %s370_s1 = inlined_call_operand.hbm [shape: f32[32,64], index: 1, kind: input, shape index: {}]   ;;  %s371_s2 = inlined_call_operand.vmem [shape: f32[1,64], index: 2, kind: input, shape index: {}]   ;;  %s372_s3 = inlined_call_operand.hbm [shape: f32[16,32], index: 3, kind: output, shape index: {0}]   ;;  %s373_s4 = inlined_call_operand.hbm [shape: f32[16,32], index: 4, kind: output, shape index: {1}]  }
   0x1   :  { %11 = vsyncpa [#allocation6], 0 }
   0x2   :  { %12 = vsyncpa [#allocation4], 0 }
   0x3   :  { %13 = vsyncpa [#allocation9], 0  ;;  %s304_s15 = smov [#allocation2]  }
   0x4   :  { %s19_s16 = sshll.u32 %s304_s15, 4  ;;  %s20_s16 = int_to_ptr.vmem [resolvable:$true] %s19_s16 }
   0x5   :  { %s224_s17 = scalar_lea.vmem %s20_s16, 256  ;;  %p229_p1 = scmp.lt.s32.totalorder %s20_s16, %s20_s16 }
   0x6   :  { %p225_p0 = scmp.ne.s32.totalorder %s20_s16, %s224_s17  ;;  %p230_p2 = scmp.lt.s32.totalorder %s224_s17, %s224_s17 }
   0x8   :  { %p231_p3 = por %p230_p2, %p229_p1 }
   0xa   :  { %p232_p4 = pnand %p231_p3, %p225_p0 }
   0xc   :  { %235 = shalt.err (!%p232_p4)
}
   0xd   :  { %s305_s18 = smov 128   ;;  %s306_s19 = smov 8  }
   0xe   :  { %25 = dma.hbm_to_vmem [thread:$0]  %s369_s0, 256, %s20_s16, [#allocation3], %s305_s18, %s305_s18, %s306_s19  }
   0xf   :  { %s307_s22 = smov [#allocation5]  }
  0x10   :  { %s31_s23 = sshll.u32 %s307_s22, 4  ;;  %s32_s23 = int_to_ptr.vmem [resolvable:$true] %s31_s23 }
  0x11   :  { %s244_s24 = scalar_lea.vmem %s32_s23, 512  ;;  %p249_p6 = scmp.lt.s32.totalorder %s32_s23, %s32_s23 }
  0x12   :  { %p245_p5 = scmp.ne.s32.totalorder %s32_s23, %s244_s24  ;;  %p250_p7 = scmp.lt.s32.totalorder %s244_s24, %s244_s24 }
  0x14   :  { %p251_p8 = por %p250_p7, %p249_p6 }
  0x16   :  { %p252_p9 = pnand %p251_p8, %p245_p5 }
  0x18   :  { %255 = shalt.err (!%p252_p9)
}
  0x19   :  { %37 = dma.hbm_to_vmem [thread:$0]  %s370_s1, 512, %s32_s23, [#allocation6], %s305_s18, %s305_s18, %s306_s19  }
  0x1a   :  { %296 = dma.done.wait [#allocation3], 256  }
  0x1b   :  { %297 = vsyncadd [#allocation3], 4294967040 }
  0x1c   :  { %298 = dma.done.wait [#allocation6], 512  }
  0x1d   :  { %299 = vsyncadd [#allocation6], 4294966784  ;;  %vm59_vm0 = vcmask 261120   ;;  %v51_v0 = vld [vmem:[#allocation5 + $0x18] sm:$0xff]  ;;  %v50_v1 = vld [vmem:[#allocation5 + $0x10] sm:$0xff]  ;;  %s308_s27 = smov [#allocation7]  }
  0x1e   :  { %198 = vmatprep.subr.mxu0 %v51_v0  ;;  %v46_v2 = vld [vmem:[#allocation2] sm:$0xff]  ;;  %v49_v3 = vld [vmem:[#allocation5 + $0x8] sm:$0xff]  ;;  %v48_v4 = vld [vmem:[#allocation5] sm:$0xff]  ;;  %s160_s28 = sshll.u32 %s308_s27, 4  ;;  %s309_s29 = smov 96   ;;  %s161_s28 = int_to_ptr.vmem [resolvable:$true] %s160_s28 }
  0x1f   :  { %199 = vmatpush3.msra.mxu0 %v51_v0  ;;  %206 = vmatprep.mubr.msk.f32.mxu0 %vm59_vm0, %v46_v2  ;;  %v47_v5 = vld [vmem:[#allocation2 + $0x8] sm:$0xff]  ;;  %v189_v6 = vld [vmem:[%s371_s2] ss:$0 sm:$0xff]  ;;  %s256_s30 = scalar_lea.vmem %s161_s28, 256  ;;  %p261_p11 = scmp.lt.s32.totalorder %s161_s28, %s161_s28 }
  0x20   :  { %200 = vmatprep.subr.mxu0 %v50_v1  ;;  %p257_p10 = scmp.ne.s32.totalorder %s161_s28, %s256_s30  ;;  %p262_p12 = scmp.lt.s32.totalorder %s256_s30, %s256_s30 }
  0x21   :  { %201 = vmatpush3.msra.mxu0 %v50_v1 }
  0x22   :  { %202 = vmatprep.subr.mxu0 %v49_v3  ;;  %p263_p13 = por %p262_p12, %p261_p11 }
  0x23   :  { %203 = vmatpush3.msra.mxu0 %v49_v3 }
  0x24   :  { %204 = vmatprep.subr.mxu0 %v48_v4  ;;  %p264_p0 = pnand %p263_p13, %p257_p10 }
  0x25   :  { %205 = vmatpush3.msra.mxu0 %v48_v4 }
  0x26   :  { %207 = vmatmul.mubr.msk.f32.vlgmr.msra.gmra.mxu0 %vm59_vm0, %v47_v5 }
  0xe6   :  { %v208_v7 = vpop.f32.mrf.mxu0 }
  0xe7   :  { %v138_v8 = vadd.f32 %v208_v7, %v189_v6 }
  0xe8   :  { %v132_v9 = vpop.f32.mrf.mxu0 }
  0xe9   :  { %v142_v10 = vmax.f32 %v138_v8, 0.0  ;;  %v133_v11 = vadd.f32 %v189_v6, %v132_v9 }
  0xeb   :  { %144 = vst.msk [vmem:[#allocation7 + $0x8] sm:$0xff] %vm59_vm0, %v142_v10  ;;  %v141_v12 = vmax.f32 %v133_v11, 0.0 }
  0xed   :  { %143 = vst.msk [vmem:[#allocation7] sm:$0xff] %vm59_vm0, %v141_v12  ;;  %147 = vrot.lane.b32.xlu0 %v141_v12, %s309_s29 }
  0xee   :  { %267 = shalt.err (!%p264_p0)
}
  0xef   :  { %166 = dma.vmem_to_hbm [thread:$0]  %s161_s28, 256, %s372_s3, [#allocation4], %s305_s18, %s305_s18, %s306_s19  }
  0xf0   :  { %s310_s6 = smov [#allocation8]  }
  0xf1   :  { %149 = vrot.lane.b32.xlu0 %v142_v10, %s309_s29  ;;  %s172_s7 = sshll.u32 %s310_s6, 4  ;;  %s173_s7 = int_to_ptr.vmem [resolvable:$true] %s172_s7 }
  0xf2   :  { %s276_s8 = scalar_lea.vmem %s173_s7, 256  ;;  %p281_p2 = scmp.lt.s32.totalorder %s173_s7, %s173_s7 }
  0xf3   :  { %p277_p1 = scmp.ne.s32.totalorder %s173_s7, %s276_s8  ;;  %p282_p3 = scmp.lt.s32.totalorder %s276_s8, %s276_s8 }
  0xf5   :  { %p283_p4 = por %p282_p3, %p281_p2 }
  0xf7   :  { %p284_p5 = pnand %p283_p4, %p277_p1 }
 0x15f   :  { %v148_v13 = vpop.permute.xlu0 %147 }
 0x160   :  { %153 = vst.msk [vmem:[#allocation8] sm:$0xff] %vm59_vm0, %v148_v13 }
 0x163   :  { %v150_v14 = vpop.permute.xlu0 %149 }
 0x164   :  { %154 = vst.msk [vmem:[#allocation8 + $0x8] sm:$0xff] %vm59_vm0, %v150_v14 }
 0x165   :  { %287 = shalt.err (!%p284_p5)
}
 0x166   :  { %178 = dma.vmem_to_hbm [thread:$0]  %s173_s7, 256, %s373_s4, [#allocation9], %s305_s18, %s305_s18, %s306_s19  }
 0x167   :  { %300 = dma.done.wait [#allocation4], 256  }
 0x168   :  { %301 = vsyncadd [#allocation4], 4294967040 }
 0x169   :  { %302 = dma.done.wait [#allocation9], 256  }
 0x16a   :  { %303 = vsyncadd [#allocation9], 4294967040 }
 0x16b   :  { %185 = vsyncpa [#allocation3], 1 }
 0x16c   :  { %186 = vsyncpa [#allocation6], 1 }
 0x16d   :  { %187 = vsyncpa [#allocation4], 1 }
 0x16e   :  { %188 = vsyncpa [#allocation9], 1 }

</bundles_post_ra>
